<compile_context>
chip_gen: v6e
topology: v6e:2x2x1
jax: 0.10.0
libtpu: 0.0.40
codegen_flags: <defaults>
</compile_context>

<pallas_src>
import jax
import jax.numpy as jnp
from jax import lax
from jax.experimental import pallas as pl
from jax.experimental.pallas import tpu as pltpu


def _round_up(v, m):
    return ((v + m - 1) // m) * m


# ---------------------------------------------------------------------------
# Kernel 1: one-time elementwise mask fold   W_masked = W * mask
# ---------------------------------------------------------------------------
def _mask_fold_kernel(w_ref, m_ref, o_ref):
    o_ref[...] = w_ref[...] * m_ref[...]


def _fold_mask(weight, mask, *, bn, bk):
    N, K = weight.shape
    return pl.pallas_call(
        _mask_fold_kernel,
        out_shape=jax.ShapeDtypeStruct((N, K), weight.dtype),
        grid_spec=pltpu.PrefetchScalarGridSpec(
            num_scalar_prefetch=0,
            grid=(N // bn, K // bk),
            in_specs=[
                pl.BlockSpec((bn, bk), lambda i, j: (i, j)),
                pl.BlockSpec((bn, bk), lambda i, j: (i, j)),
            ],
            out_specs=pl.BlockSpec((bn, bk), lambda i, j: (i, j)),
        ),
        compiler_params=pltpu.CompilerParams(
            dimension_semantics=("parallel", "parallel")),
    )(weight, mask)


# ---------------------------------------------------------------------------
# Kernel 2: tiled matmul   y = x @ W_masked.T   (K reduction on grid axis 2)
# ---------------------------------------------------------------------------
def _matmul_nt_kernel(x_ref, w_ref, o_ref, acc_ref):
    @pl.when(pl.program_id(2) == 0)
    def _init():
        acc_ref[...] = jnp.zeros_like(acc_ref)

    # x_ref: (tm, tk), w_ref: (tn, tk).  Contract the K (last) axes of both
    # operands directly -> MXU matmul with trans_b, no explicit transpose.
    acc_ref[...] += lax.dot_general(
        x_ref[...], w_ref[...],
        dimension_numbers=(((1,), (1,)), ((), ())),
        preferred_element_type=jnp.float32)

    @pl.when(pl.program_id(2) == pl.num_programs(2) - 1)
    def _store():
        o_ref[...] = acc_ref[...].astype(o_ref.dtype)


def fixed_delay_masking_forward(x, weight, mask, *, tm=None, tn=None, tk=None):
    """Forward of FixedDelayMaskingLayer:  y = x @ (weight * mask).T

    x:      (..., in_features)
    weight: (out_features, in_features)   -- nn.Linear weight layout
    mask:   (out_features, in_features)   -- fixed boolean/float buffer
    returns (..., out_features)
    """
    orig_shape = x.shape
    K = orig_shape[-1]
    x2 = x.reshape(-1, K)
    M = x2.shape[0]
    N, K2 = weight.shape
    assert K == K2 and mask.shape == weight.shape

    # MXU-shaped tiles: tm up to 256 rows, tn 128..512 lanes, tk 128..512.
    tm = tm if tm is not None else min(_round_up(M, 8), 256)
    tn = tn if tn is not None else min(_round_up(N, 128), 512)
    tk = tk if tk is not None else min(_round_up(K, 128), 512)
    assert tm % 8 == 0 and tn % 128 == 0 and tk % 128 == 0

    Mp, Np, Kp = _round_up(M, tm), _round_up(N, tn), _round_up(K, tk)

    xp = x2
    if (Mp, Kp) != (M, K):
        xp = jnp.pad(x2, ((0, Mp - M), (0, Kp - K)))
    wp = weight
    mp = mask.astype(weight.dtype)
    if (Np, Kp) != (N, K):
        wp = jnp.pad(wp, ((0, Np - N), (0, Kp - K)))
        mp = jnp.pad(mp, ((0, Np - N), (0, Kp - K)))

    # Fold the fixed mask into the weight once (outside the matmul grid):
    # halves the weight-path HBM traffic vs. re-streaming the mask every step.
    w_masked = _fold_mask(wp, mp, bn=tn, bk=tk)

    grid = (Mp // tm, Np // tn, Kp // tk)
    yp = pl.pallas_call(
        _matmul_nt_kernel,
        out_shape=jax.ShapeDtypeStruct((Mp, Np), x.dtype),
        grid_spec=pltpu.PrefetchScalarGridSpec(
            num_scalar_prefetch=0,
            grid=grid,
            in_specs=[
                pl.BlockSpec((tm, tk), lambda i, j, k: (i, k)),  # x tile
                pl.BlockSpec((tn, tk), lambda i, j, k: (j, k)),  # masked-W tile
                # NOTE: pipeline_mode=pl.Buffered(3) on the weight spec is an
                # optional further tweak if weight DMA latency is exposed.
            ],
            out_specs=pl.BlockSpec((tm, tn), lambda i, j, k: (i, j)),
            scratch_shapes=[pltpu.VMEM((tm, tn), jnp.float32)],
        ),
        compiler_params=pltpu.CompilerParams(
            dimension_semantics=("parallel", "parallel", "arbitrary")),
    )(xp, w_masked)

    y = yp[:M, :N]
    return y.reshape(*orig_shape[:-1], N)


# ---------------------------------------------------------------------------
# __init__-time mask construction (plain JAX setup, mirrors the PyTorch code):
# per (output, input) pair keep only the top_k delay taps by |weight|.
# ---------------------------------------------------------------------------
def make_topk_delay_mask(weight, n_delays, top_k):
    N, K = weight.shape
    n_input = K // n_delays
    w_r = weight.reshape(N, n_input, n_delays)
    _, idx = lax.top_k(jnp.abs(w_r), top_k)                  # (N, n_input, top_k)
    hot = jax.nn.one_hot(idx, n_delays, dtype=jnp.float32)   # (N, n_input, top_k, n_delays)
    mask = (hot.sum(axis=2) > 0)                             # bool, scatter of top-k taps
    return mask.reshape(N, K)


if __name__ == "__main__":
    key = jax.random.PRNGKey(0)

    # --- Test 1: small shapes consistent with the module --------------------
    batch, n_input, n_delays, top_k = 4, 16, 8, 3
    in_features = n_input * n_delays          # 128
    out_features = 64

    k1, k2, key = jax.random.split(key, 3)
    bound = 1.0 / float(jnp.sqrt(in_features))
    weight = jax.random.uniform(k1, (out_features, in_features),
                                minval=-bound, maxval=bound, dtype=jnp.float32)
    x = jax.random.normal(k2, (batch, in_features), dtype=jnp.float32)
    mask = make_topk_delay_mask(weight, n_delays, top_k)

    y = jax.block_until_ready(fixed_delay_masking_forward(x, weight, mask))
    y_ref = x @ (weight * mask.astype(weight.dtype)).T
    assert y.shape == y_ref.shape
    assert jnp.allclose(y, y_ref, atol=1e-4, rtol=1e-4), "test 1 mismatch"

    # --- Test 2: forces a multi-step (2,2,2) grid to exercise the K-axis ----
    # accumulator path (small explicit tiles just for the test).
    batch2, n_input2, n_delays2, top_k2 = 16, 64, 4, 2
    in2 = n_input2 * n_delays2                # 256
    out2 = 256
    k3, k4, _ = jax.random.split(key, 3)
    bound2 = 1.0 / float(jnp.sqrt(in2))
    weight2 = jax.random.uniform(k3, (out2, in2),
                                 minval=-bound2, maxval=bound2, dtype=jnp.float32)
    x2 = jax.random.normal(k4, (batch2, in2), dtype=jnp.float32)
    mask2 = make_topk_delay_mask(weight2, n_delays2, top_k2)

    y2 = jax.block_until_ready(
        fixed_delay_masking_forward(x2, weight2, mask2, tm=8, tn=128, tk=128))
    y2_ref = x2 @ (weight2 * mask2.astype(weight2.dtype)).T
    assert jnp.allclose(y2, y2_ref, atol=1e-4, rtol=1e-4), "test 2 mismatch"

    print("KERNEL_OK")
</pallas_src>

<mosaic_0001>
module attributes {stable_mosaic.version = 11 : i64} {
  func.func @_mask_fold_kernel(%arg0: i32, %arg1: i32, %arg2: memref<128x128xf32, #tpu.memory_space<vmem>>, %arg3: memref<128x128xf32, #tpu.memory_space<vmem>>, %arg4: memref<128x128xf32, #tpu.memory_space<vmem>>) attributes {dimension_semantics = [#tpu.dimension_semantics<parallel>, #tpu.dimension_semantics<parallel>], iteration_bounds = array<i64: 1, 1>, scalar_prefetch = 0 : i64, scratch_operands = 0 : i64, tpu.core_type = #tpu.core_type<tc>, window_params = [{transform_indices = @transform_0, window_bounds = array<i64: 128, 128>}, {transform_indices = @transform_1, window_bounds = array<i64: 128, 128>}, {transform_indices = @transform_2, window_bounds = array<i64: 128, 128>}]} {
    %c0 = arith.constant 0 : index
    %c0_0 = arith.constant 0 : index
    %0 = vector.load %arg2[%c0, %c0_0] : memref<128x128xf32, #tpu.memory_space<vmem>>, vector<128x128xf32>
    %c0_1 = arith.constant 0 : index
    %c0_2 = arith.constant 0 : index
    %1 = vector.load %arg3[%c0_1, %c0_2] : memref<128x128xf32, #tpu.memory_space<vmem>>, vector<128x128xf32>
    %2 = arith.mulf %0, %1 : vector<128x128xf32>
    %c0_3 = arith.constant 0 : index
    %c0_4 = arith.constant 0 : index
    %3 = vector.load %arg4[%c0_3, %c0_4] : memref<128x128xf32, #tpu.memory_space<vmem>>, vector<128x128xf32>
    tpu.vector_store %arg4[%c0_3, %c0_4], %2 {strides = array<i32>} : memref<128x128xf32, #tpu.memory_space<vmem>>, vector<128x128xf32>,
    return
  }
  func.func @transform_0(%arg0: i32, %arg1: i32) -> (i32, i32) {
    %c0_i32 = arith.constant 0 : i32
    return %arg0, %arg1 : i32, i32
  }
  func.func @transform_1(%arg0: i32, %arg1: i32) -> (i32, i32) {
    %c0_i32 = arith.constant 0 : i32
    return %arg0, %arg1 : i32, i32
  }
  func.func @transform_2(%arg0: i32, %arg1: i32) -> (i32, i32) {
    %c0_i32 = arith.constant 0 : i32
    return %arg0, %arg1 : i32, i32
  }
}

</mosaic_0001>

<bundles_post_ra>
// kernel: tpu_custom_call.1
= control target key start
LH: loop header
LB: loop body
LE: loop exit
PB: predicated region body
PF: predicated region fallthrough
CT: control target
= control target key end

     0   :  { %7 = vsyncpa [#allocation3], 0  ;;  %s231_s0 = inlined_call_operand.hbm [shape: f32[128,128], index: 0, kind: input, shape index: {}]   ;;  %s232_s1 = inlined_call_operand.hbm [shape: f32[128,128], index: 1, kind: input, shape index: {}]   ;;  %s233_s2 = inlined_call_operand.hbm [shape: f32[128,128], index: 2, kind: output, shape index: {}]  }
   0x1   :  { %8 = vsyncpa [#allocation6], 0 }
   0x2   :  { %9 = vsyncpa [#allocation4], 0  ;;  %s193_s9 = smov [#allocation2]  }
   0x3   :  { %s15_s10 = sshll.u32 %s193_s9, 4  ;;  %s16_s10 = int_to_ptr.vmem [resolvable:$true] %s15_s10 }
   0x4   :  { %s135_s11 = scalar_lea.vmem %s16_s10, 2048  ;;  %p140_p1 = scmp.lt.s32.totalorder %s16_s10, %s16_s10 }
   0x5   :  { %p136_p0 = scmp.ne.s32.totalorder %s16_s10, %s135_s11  ;;  %p141_p2 = scmp.lt.s32.totalorder %s135_s11, %s135_s11 }
   0x7   :  { %p142_p3 = por %p141_p2, %p140_p1 }
   0x9   :  { %p143_p4 = pnand %p142_p3, %p136_p0 }
   0xb   :  { %146 = shalt.err (!%p143_p4)
}
   0xc   :  { %s194_s12 = smov 128   ;;  %s195_s13 = smov 8  }
   0xd   :  { %21 = dma.hbm_to_vmem [thread:$0]  %s231_s0, 2048, %s16_s10, [#allocation3], %s194_s12, %s194_s12, %s195_s13  }
   0xe   :  { %s196_s16 = smov [#allocation5]  }
   0xf   :  { %s27_s17 = sshll.u32 %s196_s16, 4  ;;  %s28_s17 = int_to_ptr.vmem [resolvable:$true] %s27_s17 }
  0x10   :  { %s155_s18 = scalar_lea.vmem %s28_s17, 2048  ;;  %p160_p6 = scmp.lt.s32.totalorder %s28_s17, %s28_s17 }
  0x11   :  { %p156_p5 = scmp.ne.s32.totalorder %s28_s17, %s155_s18  ;;  %p161_p7 = scmp.lt.s32.totalorder %s155_s18, %s155_s18 }
  0x13   :  { %p162_p8 = por %p161_p7, %p160_p6 }
  0x15   :  { %p163_p9 = pnand %p162_p8, %p156_p5 }
  0x17   :  { %166 = shalt.err (!%p163_p9)
}
  0x18   :  { %33 = dma.hbm_to_vmem [thread:$0]  %s232_s1, 2048, %s28_s17, [#allocation6], %s194_s12, %s194_s12, %s195_s13  }
  0x19   :  { %187 = dma.done.wait [#allocation3], 2048  }
  0x1a   :  { %188 = vsyncadd [#allocation3], 4294965248 }
  0x1b   :  { %189 = dma.done.wait [#allocation6], 2048  }
  0x1c   :  { %190 = vsyncadd [#allocation6], 4294965248  ;;  %v40_v0 = vld [vmem:[#allocation2] sm:$0xff]  ;;  %v41_v2 = vld [vmem:[#allocation2 + $0x8] sm:$0xff]  ;;  %s197_s0 = smov [#allocation7]  }
  0x1d   :  { %v56_v1 = vld [vmem:[#allocation5] sm:$0xff]  ;;  %v57_v4 = vld [vmem:[#allocation5 + $0x8] sm:$0xff]  ;;  %v42_v5 = vld [vmem:[#allocation2 + $0x10] sm:$0xff]  ;;  %s109_s1 = sshll.u32 %s197_s0, 4  ;;  %s110_s1 = int_to_ptr.vmem [resolvable:$true] %s109_s1 }
  0x1e   :  { %v72_v3 = vmul.f32 %v56_v1, %v40_v0  ;;  %v58_v6 = vld [vmem:[#allocation5 + $0x10] sm:$0xff]  ;;  %v73_v7 = vmul.f32 %v57_v4, %v41_v2  ;;  %v43_v9 = vld [vmem:[#allocation2 + $0x18] sm:$0xff]  ;;  %v44_v11 = vld [vmem:[#allocation2 + $0x20] sm:$0xff]  ;;  %s167_s21 = scalar_lea.vmem %s110_s1, 2048  ;;  %p172_p11 = scmp.lt.s32.totalorder %s110_s1, %s110_s1 }
  0x1f   :  { %v74_v8 = vmul.f32 %v58_v6, %v42_v5  ;;  %v59_v10 = vld [vmem:[#allocation5 + $0x18] sm:$0xff]  ;;  %v60_v13 = vld [vmem:[#allocation5 + $0x20] sm:$0xff]  ;;  %v45_v14 = vld [vmem:[#allocation2 + $0x28] sm:$0xff]  ;;  %p168_p10 = scmp.ne.s32.totalorder %s110_s1, %s167_s21  ;;  %p173_p12 = scmp.lt.s32.totalorder %s167_s21, %s167_s21 }
  0x20   :  { %88 = vst [vmem:[#allocation7] sm:$0xff] %v72_v3  ;;  %v75_v12 = vmul.f32 %v59_v10, %v43_v9  ;;  %v61_v15 = vld [vmem:[#allocation5 + $0x28] sm:$0xff]  ;;  %89 = vst [vmem:[#allocation7 + $0x8] sm:$0xff] %v73_v7  ;;  %v76_v16 = vmul.f32 %v60_v13, %v44_v11  ;;  %v46_v18 = vld [vmem:[#allocation2 + $0x30] sm:$0xff] }
  0x21   :  { %90 = vst [vmem:[#allocation7 + $0x10] sm:$0xff] %v74_v8  ;;  %v77_v17 = vmul.f32 %v61_v15, %v45_v14  ;;  %v62_v19 = vld [vmem:[#allocation5 + $0x30] sm:$0xff]  ;;  %v47_v20 = vld [vmem:[#allocation2 + $0x38] sm:$0xff]  ;;  %v48_v23 = vld [vmem:[#allocation2 + $0x40] sm:$0xff]  ;;  %p174_p13 = por %p173_p12, %p172_p11 }
  0x22   :  { %91 = vst [vmem:[#allocation7 + $0x18] sm:$0xff] %v75_v12  ;;  %v78_v21 = vmul.f32 %v62_v19, %v46_v18  ;;  %v63_v22 = vld [vmem:[#allocation5 + $0x38] sm:$0xff]  ;;  %v64_v24 = vld [vmem:[#allocation5 + $0x40] sm:$0xff]  ;;  %92 = vst [vmem:[#allocation7 + $0x20] sm:$0xff] %v76_v16 }
  0x23   :  { %93 = vst [vmem:[#allocation7 + $0x28] sm:$0xff] %v77_v17  ;;  %v79_v25 = vmul.f32 %v63_v22, %v47_v20  ;;  %v80_v26 = vmul.f32 %v64_v24, %v48_v23  ;;  %v49_v27 = vld [vmem:[#allocation2 + $0x48] sm:$0xff]  ;;  %v50_v29 = vld [vmem:[#allocation2 + $0x50] sm:$0xff]  ;;  %v51_v32 = vld [vmem:[#allocation2 + $0x58] sm:$0xff]  ;;  %p175_p0 = pnand %p174_p13, %p168_p10 }
  0x24   :  { %v65_v28 = vld [vmem:[#allocation5 + $0x48] sm:$0xff]  ;;  %94 = vst [vmem:[#allocation7 + $0x30] sm:$0xff] %v78_v21  ;;  %v66_v31 = vld [vmem:[#allocation5 + $0x50] sm:$0xff]  ;;  %v67_v33 = vld [vmem:[#allocation5 + $0x58] sm:$0xff] }
  0x25   :  { %v81_v30 = vmul.f32 %v65_v28, %v49_v27  ;;  %95 = vst [vmem:[#allocation7 + $0x38] sm:$0xff] %v79_v25  ;;  %96 = vst [vmem:[#allocation7 + $0x40] sm:$0xff] %v80_v26  ;;  %v82_v34 = vmul.f32 %v66_v31, %v50_v29  ;;  %v83_v35 = vmul.f32 %v67_v33, %v51_v32  ;;  %v52_v36 = vld [vmem:[#allocation2 + $0x60] sm:$0xff]  ;;  %v53_v38 = vld [vmem:[#allocation2 + $0x68] sm:$0xff] }
  0x26   :  { %v68_v37 = vld [vmem:[#allocation5 + $0x60] sm:$0xff]  ;;  %v69_v40 = vld [vmem:[#allocation5 + $0x68] sm:$0xff]  ;;  %v54_v41 = vld [vmem:[#allocation2 + $0x70] sm:$0xff] }
  0x27   :  { %97 = vst [vmem:[#allocation7 + $0x48] sm:$0xff] %v81_v30  ;;  %v84_v39 = vmul.f32 %v68_v37, %v52_v36  ;;  %v70_v42 = vld [vmem:[#allocation5 + $0x70] sm:$0xff]  ;;  %98 = vst [vmem:[#allocation7 + $0x50] sm:$0xff] %v82_v34  ;;  %v85_v43 = vmul.f32 %v69_v40, %v53_v38  ;;  %v55_v45 = vld [vmem:[#allocation2 + $0x78] sm:$0xff] }
  0x28   :  { %99 = vst [vmem:[#allocation7 + $0x58] sm:$0xff] %v83_v35  ;;  %v86_v44 = vmul.f32 %v70_v42, %v54_v41  ;;  %v71_v46 = vld [vmem:[#allocation5 + $0x78] sm:$0xff] }
  0x29   :  { %100 = vst [vmem:[#allocation7 + $0x60] sm:$0xff] %v84_v39  ;;  %v87_v47 = vmul.f32 %v71_v46, %v55_v45  ;;  %101 = vst [vmem:[#allocation7 + $0x68] sm:$0xff] %v85_v43 }
  0x2a   :  { %102 = vst [vmem:[#allocation7 + $0x70] sm:$0xff] %v86_v44 }
  0x2b   :  { %103 = vst [vmem:[#allocation7 + $0x78] sm:$0xff] %v87_v47 }
  0x2c   :  { %178 = shalt.err (!%p175_p0)
}
  0x2d   :  { %115 = dma.vmem_to_hbm [thread:$0]  %s110_s1, 2048, %s233_s2, [#allocation4], %s194_s12, %s194_s12, %s195_s13  }
  0x2e   :  { %191 = dma.done.wait [#allocation4], 2048  }
  0x2f   :  { %192 = vsyncadd [#allocation4], 4294965248 }
  0x30   :  { %119 = vsyncpa [#allocation3], 1 }
  0x31   :  { %120 = vsyncpa [#allocation6], 1 }
  0x32   :  { %121 = vsyncpa [#allocation4], 1 }

</bundles_post_ra>
